<compile_context>
chip_gen: v6e
topology: v6e:2x2x1
jax: 0.10.0
libtpu: 0.0.40
codegen_flags: <defaults>
</compile_context>

<pallas_src>
import jax
import jax.numpy as jnp
from jax.experimental import pallas as pl
from jax.experimental.pallas import tpu as pltpu

LOSS_WEIGHT = 0.0005
AVERAGE = True

_LANES = 512              # lane-dense last dim (multiple of 128 -> unmasked vst)
_TILE_ROWS = 1024         # 1024 x 512 f32 = 2 MiB/buffer; 8 buffers = 16 MiB
_MIN_GRID_STEPS = 4       # keep both v7x TensorCores busy on mid-size inputs
_MIN_PALLAS_ELEMS = 128 * 1024   # below this, fused XLA is faster


def _cdiv(a, b):
    return -(-a // b)


def _l1_norm_loss_kernel(scale_ref, x1_ref, x2_ref, x3_ref, o_ref):
    # 2 adds + 1 mul per element; accumulate in f32 regardless of input dtype.
    s = (x1_ref[...].astype(jnp.float32)
         + x2_ref[...].astype(jnp.float32)
         + x3_ref[...].astype(jnp.float32))
    o_ref[...] = (s * scale_ref[0]).astype(o_ref.dtype)


def l1_norm_loss(x1, x2, x3, length,
                 loss_weight=LOSS_WEIGHT, average=AVERAGE,
                 min_pallas_elems=_MIN_PALLAS_ELEMS):
    """Pallas implementation of L1NormLoss.forward."""
    assert x1.shape == x2.shape == x3.shape
    orig_shape = x1.shape
    out_dtype = x1.dtype
    total = x1.size

    # Fold every scalar into a single multiplier: loss_weight / (3 * length).
    scale = jnp.float32(loss_weight) / jnp.float32(3.0)
    if average:
        scale = scale / jnp.asarray(length, dtype=jnp.float32)

    if total < min_pallas_elems or total == 0:
        # Small inputs: XLA's fused elementwise op beats the launch overhead.
        out = (x1.astype(jnp.float32) + x2.astype(jnp.float32)
               + x3.astype(jnp.float32)) * scale
        return out.astype(out_dtype)

    scale_arr = jnp.reshape(scale, (1,)).astype(jnp.float32)

    # Lane-dense layout: flatten; pad ONLY to the next multiple of _LANES
    # (<= 511 elements), never to a full tile-grid multiple.
    rows = _cdiv(total, _LANES)
    padded = rows * _LANES

    # Tile rows: as large as possible (<= _TILE_ROWS) but small enough that the
    # grid has >= _MIN_GRID_STEPS steps; must be a multiple of 8 unless the
    # block covers the whole array.
    if rows <= 8:
        tile_rows = rows                      # full-array block (exempt from 8-row rule)
    else:
        target = _cdiv(rows, _MIN_GRID_STEPS)
        target = ((target + 7) // 8) * 8      # round up to sublane multiple
        tile_rows = min(_TILE_ROWS, target)
    n_blocks = _cdiv(rows, tile_rows)         # ragged last block is masked by Pallas

    def _prep(x):
        xf = x.reshape(-1)
        if padded != total:
            xf = jnp.pad(xf, (0, padded - total))
        return xf.reshape(rows, _LANES)

    x1f, x2f, x3f = _prep(x1), _prep(x2), _prep(x3)

    tile_spec = pl.BlockSpec((tile_rows, _LANES), lambda i: (i, 0))

    bytes_per_elem = (3 * jnp.dtype(x1.dtype).itemsize
                      + jnp.dtype(out_dtype).itemsize)
    cost = pl.CostEstimate(flops=3 * padded,
                           transcendentals=0,
                           bytes_accessed=bytes_per_elem * padded)

    out = pl.pallas_call(
        _l1_norm_loss_kernel,
        out_shape=jax.ShapeDtypeStruct((rows, _LANES), out_dtype),
        grid=(n_blocks,),
        in_specs=[
            pl.BlockSpec(memory_space=pltpu.MemorySpace.SMEM),  # fused scale scalar
            tile_spec,                                          # x1
            tile_spec,                                          # x2
            tile_spec,                                          # x3
        ],
        out_specs=tile_spec,
        compiler_params=pltpu.CompilerParams(
            dimension_semantics=("parallel",),
            vmem_limit_bytes=32 * 1024 * 1024,
        ),
        cost_estimate=cost,
    )(scale_arr, x1f, x2f, x3f)

    out = out.reshape(-1)
    if padded != total:
        out = out[:total]
    return out.reshape(orig_shape)


def _reference(x1, x2, x3, length, loss_weight=LOSS_WEIGHT, average=AVERAGE):
    r = (x1 + x2 + x3) / 3.0
    if average:
        r = r / length
    return loss_weight * r


if __name__ == "__main__":
    key = jax.random.PRNGKey(0)
    k1, k2, k3 = jax.random.split(key, 3)

    # 1) Small demo shape consistent with the module (NCHW feature maps).
    #    Force the Pallas path (defaults would route this tiny tensor to XLA).
    B, C, H, W = 2, 4, 16, 16
    x1 = jax.random.normal(k1, (B, C, H, W), dtype=jnp.float32)
    x2 = jax.random.normal(k2, (B, C, H, W), dtype=jnp.float32)
    x3 = jax.random.normal(k3, (B, C, H, W), dtype=jnp.float32)
    length = 16.0
    out = jax.block_until_ready(
        l1_norm_loss(x1, x2, x3, length, min_pallas_elems=0))
    ref = _reference(x1, x2, x3, length)
    assert out.shape == ref.shape and out.dtype == ref.dtype
    assert jnp.allclose(out, ref, rtol=1e-6, atol=1e-7), "mismatch (small)"

    # 2) Larger, lane-aligned input: multi-step grid, default routing.
    shp = (4, 16, 64, 64)                    # 262144 elems -> 4+ grid steps
    y1 = jax.random.normal(k1, shp, dtype=jnp.float32)
    y2 = jax.random.normal(k2, shp, dtype=jnp.float32)
    y3 = jax.random.normal(k3, shp, dtype=jnp.float32)
    out2 = jax.block_until_ready(l1_norm_loss(y1, y2, y3, 32.0))
    ref2 = _reference(y1, y2, y3, 32.0)
    assert jnp.allclose(out2, ref2, rtol=1e-6, atol=1e-7), "mismatch (large)"

    # 3) Non-lane-aligned size: exercises pad-to-lane + ragged last grid block.
    shp = (2, 3, 100, 129)                   # 77400 elems, not a multiple of 512
    z1 = jax.random.normal(k1, shp, dtype=jnp.float32)
    z2 = jax.random.normal(k2, shp, dtype=jnp.float32)
    z3 = jax.random.normal(k3, shp, dtype=jnp.float32)
    out3 = jax.block_until_ready(
        l1_norm_loss(z1, z2, z3, 7.0, min_pallas_elems=0))
    ref3 = _reference(z1, z2, z3, 7.0)
    assert jnp.allclose(out3, ref3, rtol=1e-6, atol=1e-7), "mismatch (ragged)"

    print("KERNEL_OK")
</pallas_src>

<mosaic_0001>
module attributes {stable_mosaic.version = 11 : i64} {
  func.func @_l1_norm_loss_kernel(%arg0: i32, %arg1: memref<1xf32, #tpu.memory_space<smem>>, %arg2: memref<4x512xf32, #tpu.memory_space<vmem>>, %arg3: memref<4x512xf32, #tpu.memory_space<vmem>>, %arg4: memref<4x512xf32, #tpu.memory_space<vmem>>, %arg5: memref<4x512xf32, #tpu.memory_space<vmem>>) attributes {dimension_semantics = [#tpu.dimension_semantics<parallel>], iteration_bounds = array<i64: 1>, scalar_prefetch = 0 : i64, scratch_operands = 0 : i64, tpu.core_type = #tpu.core_type<tc>, window_params = [{transform_indices = @transform_0, window_bounds = array<i64: 1>}, {transform_indices = @transform_1, window_bounds = array<i64: 4, 512>}, {transform_indices = @transform_2, window_bounds = array<i64: 4, 512>}, {transform_indices = @transform_3, window_bounds = array<i64: 4, 512>}, {transform_indices = @transform_4, window_bounds = array<i64: 4, 512>}]} {
    %c0 = arith.constant 0 : index
    %c0_0 = arith.constant 0 : index
    %0 = vector.load %arg2[%c0, %c0_0] : memref<4x512xf32, #tpu.memory_space<vmem>>, vector<4x512xf32>
    %c0_1 = arith.constant 0 : index
    %c0_2 = arith.constant 0 : index
    %1 = vector.load %arg3[%c0_1, %c0_2] : memref<4x512xf32, #tpu.memory_space<vmem>>, vector<4x512xf32>
    %2 = arith.addf %0, %1 : vector<4x512xf32>
    %c0_3 = arith.constant 0 : index
    %c0_4 = arith.constant 0 : index
    %3 = vector.load %arg4[%c0_3, %c0_4] : memref<4x512xf32, #tpu.memory_space<vmem>>, vector<4x512xf32>
    %4 = arith.addf %2, %3 : vector<4x512xf32>
    %c0_5 = arith.constant 0 : index
    %5 = memref.load %arg1[%c0_5] : memref<1xf32, #tpu.memory_space<smem>>
    %6 = vector.broadcast %5 : f32 to vector<4x512xf32>
    %7 = arith.mulf %4, %6 : vector<4x512xf32>
    %c0_6 = arith.constant 0 : index
    %c0_7 = arith.constant 0 : index
    %8 = vector.load %arg5[%c0_6, %c0_7] : memref<4x512xf32, #tpu.memory_space<vmem>>, vector<4x512xf32>
    tpu.vector_store %arg5[%c0_6, %c0_7], %7 {strides = array<i32>} : memref<4x512xf32, #tpu.memory_space<vmem>>, vector<4x512xf32>,
    return
  }
  func.func @transform_0(%arg0: i32) -> i32 {
    %c0_i32 = arith.constant 0 : i32
    %c0_i32_0 = arith.constant 0 : i32
    return %c0_i32 : i32
  }
  func.func @transform_1(%arg0: i32) -> (i32, i32) {
    %c0_i32 = arith.constant 0 : i32
    %c0_i32_0 = arith.constant 0 : i32
    return %arg0, %c0_i32 : i32, i32
  }
  func.func @transform_2(%arg0: i32) -> (i32, i32) {
    %c0_i32 = arith.constant 0 : i32
    %c0_i32_0 = arith.constant 0 : i32
    return %arg0, %c0_i32 : i32, i32
  }
  func.func @transform_3(%arg0: i32) -> (i32, i32) {
    %c0_i32 = arith.constant 0 : i32
    %c0_i32_0 = arith.constant 0 : i32
    return %arg0, %c0_i32 : i32, i32
  }
  func.func @transform_4(%arg0: i32) -> (i32, i32) {
    %c0_i32 = arith.constant 0 : i32
    %c0_i32_0 = arith.constant 0 : i32
    return %arg0, %c0_i32 : i32, i32
  }
}

</mosaic_0001>

<bundles_post_ra>
// kernel: tpu_custom_call.1
= control target key start
LH: loop header
LB: loop body
LE: loop exit
PB: predicated region body
PF: predicated region fallthrough
CT: control target
= control target key end

     0   :  { %10 = vsyncpa [#allocation4], 0  ;;  %s220_s0 = inlined_call_operand.<no memory space> [shape: f32[1], index: 0, kind: input, shape index: {}]   ;;  %s221_s1 = inlined_call_operand.hbm [shape: f32[4,512], index: 1, kind: input, shape index: {}]   ;;  %s222_s2 = inlined_call_operand.hbm [shape: f32[4,512], index: 2, kind: input, shape index: {}]   ;;  %s223_s3 = inlined_call_operand.hbm [shape: f32[4,512], index: 3, kind: input, shape index: {}]   ;;  %s224_s4 = inlined_call_operand.hbm [shape: f32[4,512], index: 4, kind: output, shape index: {}]  }
   0x1   :  { %11 = vsyncpa [#allocation7], 0 }
   0x2   :  { %12 = vsyncpa [#allocation5], 0  ;;  %s176_s15 = smov [#allocation6]   ;;  %s177_s17 = smov [#allocation3]  }
   0x3   :  { %s31_s16 = sshll.u32 %s176_s15, 4  ;;  %s21_s18 = sshll.u32 %s177_s17, 4  ;;  %s32_s16 = int_to_ptr.vmem [resolvable:$true] %s31_s16  ;;  %s22_s18 = int_to_ptr.vmem [resolvable:$true] %s21_s18 }
   0x4   :  { %s98_s19 = scalar_lea.vmem %s32_s16, 256  ;;  %p103_p1 = scmp.lt.s32.totalorder %s32_s16, %s32_s16 }
   0x5   :  { %p99_p0 = scmp.ne.s32.totalorder %s32_s16, %s98_s19  ;;  %p104_p2 = scmp.lt.s32.totalorder %s98_s19, %s98_s19 }
   0x7   :  { %p105_p3 = por %p104_p2, %p103_p1 }
   0x9   :  { %p106_p4 = pnand %p105_p3, %p99_p0 }
   0xb   :  { %109 = shalt.err (!%p106_p4)
}
   0xc   :  { %34 = dma.hbm_to_vmem [thread:$0]  %s222_s2, 256, %s32_s16, [#allocation7]  }
   0xd   :  { %s118_s22 = scalar_lea.vmem %s22_s18, 256  ;;  %p123_p6 = scmp.lt.s32.totalorder %s22_s18, %s22_s18 }
   0xe   :  { %p119_p5 = scmp.ne.s32.totalorder %s22_s18, %s118_s22  ;;  %p124_p7 = scmp.lt.s32.totalorder %s118_s22, %s118_s22 }
  0x10   :  { %p125_p8 = por %p124_p7, %p123_p6 }
  0x12   :  { %p126_p9 = pnand %p125_p8, %p119_p5 }
  0x14   :  { %129 = shalt.err (!%p126_p9)
}
  0x15   :  { %24 = dma.hbm_to_vmem [thread:$0]  %s221_s1, 256, %s22_s18, [#allocation4]  }
  0x16   :  { %s178_s25 = smov [#allocation8]  }
  0x17   :  { %s41_s26 = sshll.u32 %s178_s25, 4  ;;  %s42_s26 = int_to_ptr.vmem [resolvable:$true] %s41_s26 }
  0x18   :  { %s138_s27 = scalar_lea.vmem %s42_s26, 256  ;;  %p143_p11 = scmp.lt.s32.totalorder %s42_s26, %s42_s26 }
  0x19   :  { %p139_p10 = scmp.ne.s32.totalorder %s42_s26, %s138_s27  ;;  %p144_p12 = scmp.lt.s32.totalorder %s138_s27, %s138_s27 }
  0x1b   :  { %p145_p13 = por %p144_p12, %p143_p11 }
  0x1d   :  { %p146_p0 = pnand %p145_p13, %p139_p10 }
  0x1f   :  { %149 = shalt.err (!%p146_p0)
}
  0x20   :  { %44 = dma.hbm_to_vmem [thread:$0]  %s223_s3, 256, %s42_s26, [#allocation7]  }
  0x21   :  { %170 = dma.done.wait [#allocation4], 256  }
  0x22   :  { %171 = vsyncadd [#allocation4], 4294967040 }
  0x23   :  { %172 = dma.done.wait [#allocation7], 512  }
  0x24   :  { %173 = vsyncadd [#allocation7], 4294966784  ;;  %v54_v0 = vld [vmem:[#allocation3] sm:$0xff]  ;;  %v56_v1 = vld [vmem:[#allocation6] sm:$0xff]  ;;  %v65_v7 = vstv %s220_s0  ;;  %s179_s30 = smov [#allocation9]  }
  0x25   :  { %v60_v2 = vld [vmem:[#allocation8] sm:$0xff]  ;;  %v58_v3 = vadd.f32 %v56_v1, %v54_v0  ;;  %v55_v4 = vld [vmem:[#allocation3 + $0x8] sm:$0xff]  ;;  %v57_v5 = vld [vmem:[#allocation6 + $0x8] sm:$0xff]  ;;  %s76_s5 = sshll.u32 %s179_s30, 4  ;;  %s77_s5 = int_to_ptr.vmem [resolvable:$true] %s76_s5 }
  0x26   :  { %v61_v6 = vld [vmem:[#allocation8 + $0x8] sm:$0xff]  ;;  %v59_v8 = vadd.f32 %v57_v5, %v55_v4  ;;  %s150_s3 = scalar_lea.vmem %s77_s5, 256  ;;  %p155_p2 = scmp.lt.s32.totalorder %s77_s5, %s77_s5 }
  0x27   :  { %v62_v9 = vadd.f32 %v60_v2, %v58_v3  ;;  %p151_p1 = scmp.ne.s32.totalorder %s77_s5, %s150_s3  ;;  %p156_p3 = scmp.lt.s32.totalorder %s150_s3, %s150_s3 }
  0x28   :  { %v63_v10 = vadd.f32 %v61_v6, %v59_v8 }
  0x29   :  { %v66_v11 = vmul.f32 %v65_v7, %v62_v9  ;;  %p157_p4 = por %p156_p3, %p155_p2 }
  0x2a   :  { %v67_v12 = vmul.f32 %v65_v7, %v63_v10 }
  0x2b   :  { %68 = vst [vmem:[#allocation9] sm:$0xff] %v66_v11  ;;  %p158_p5 = pnand %p157_p4, %p151_p1 }
  0x2c   :  { %69 = vst [vmem:[#allocation9 + $0x8] sm:$0xff] %v67_v12 }
  0x2d   :  { %161 = shalt.err (!%p158_p5)
}
  0x2e   :  { %79 = dma.vmem_to_hbm [thread:$0]  %s77_s5, 256, %s224_s4, [#allocation5]  }
  0x2f   :  { %174 = dma.done.wait [#allocation5], 256  }
  0x30   :  { %175 = vsyncadd [#allocation5], 4294967040 }
  0x31   :  { %83 = vsyncpa [#allocation4], 1 }
  0x32   :  { %84 = vsyncpa [#allocation7], 1 }
  0x33   :  { %85 = vsyncpa [#allocation5], 1 }

</bundles_post_ra>
